<compile_context>
chip_gen: v7x
topology: tpu7x:2x2x1
jax: 0.10.0
libtpu: 0.0.40
codegen_flags: <defaults>
</compile_context>

<pallas_src>
import functools

import jax
import jax.numpy as jnp
from jax import lax
from jax.experimental import pallas as pl
from jax.experimental.pallas import tpu as pltpu

IGNORE_INDEX = -100


def _round_up(x, m):
    return (x + m - 1) // m * m


def _arc_loss_kernel(cos_ref, tgt_ref, phit_ref, loss_ref, cnt_ref,
                     m_ref, l_ref, *, n_rows, n_cols):
    """Online-logsumexp cross-entropy over class tiles for one row block."""
    i = pl.program_id(0)           # row-block index   ("parallel")
    j = pl.program_id(1)           # class-tile index  ("arbitrary", innermost)
    nj = pl.num_programs(1)

    tm, tc = cos_ref.shape
    tgt = tgt_ref[...]                               # (TM, 1) int32
    phi_t = phit_ref[...]                            # (TM, 1) f32 = phi[i, target[i]]

    # Init running (max, sum-exp) with the target-column term exp(phi_t - m).
    @pl.when(j == 0)
    def _():
        m_ref[...] = phi_t
        l_ref[...] = jnp.ones_like(phi_t)

    cos = cos_ref[...].astype(jnp.float32)           # (TM, TC), bf16 -> f32 per tile

    # Tile-local column ids compared against per-row scalars (no full-tile add).
    local_col = lax.broadcasted_iota(jnp.int32, (tm, tc), 1)
    tgt_local = tgt - j * tc                         # (TM, 1), broadcasts
    # The target column is replaced by phi_t (already in the accumulator).
    col_ok = local_col != tgt_local
    if n_cols % tc != 0:
        # Only the last class tile has out-of-range (undefined-VMEM) columns;
        # statically elided when C divides the class tile.
        limit = jnp.where(j == nj - 1, n_cols - j * tc, tc)
        col_ok = col_ok & (local_col < limit)

    cos_masked = jnp.where(col_ok, cos, jnp.float32(-1e30))
    tile_max = jnp.max(cos_masked, axis=-1, keepdims=True)        # (TM, 1)

    m_old = m_ref[...]
    m_new = jnp.maximum(m_old, tile_max)
    # Masked columns: exp(-1e30 - m_new) underflows to 0 -> no second where.
    p = jnp.exp(cos_masked - m_new)                               # (TM, TC)
    l_ref[...] = l_ref[...] * jnp.exp(m_old - m_new) + jnp.sum(
        p, axis=-1, keepdims=True)
    m_ref[...] = m_new

    # Finalize this row block: per-row CE, masked sum -> per-block partials.
    @pl.when(j == nj - 1)
    def _():
        lse = m_ref[...] + jnp.log(l_ref[...])                    # (TM, 1)
        per_row = lse - phi_t                                     # lse - logit[target]
        valid = tgt != IGNORE_INDEX
        if n_rows % tm != 0:
            row = i * tm + lax.broadcasted_iota(jnp.int32, (tm, 1), 0)
            valid = valid & (row < n_rows)                        # row-tail mask
        loss_ref[0, 0] = jnp.sum(jnp.where(valid, per_row, 0.0))
        cnt_ref[0, 0] = jnp.sum(valid.astype(jnp.float32))


def parallel_arc_loss(cos, phi, target, *, row_block=512, class_block=4096,
                      vmem_limit_bytes=48 * 1024 * 1024):
    """ArcFace loss forward (reduction='mean', weight=None, ignore_index=-100).

    cos/phi may be float32 or bfloat16; all in-kernel math is f32.
    """
    n, c = cos.shape
    assert phi.shape == (n, c)

    tgt = target.astype(jnp.int32)
    # phi is only ever read at the target column -> row-wise gather of one
    # scalar per row in the wrapper instead of streaming the full (N, C) phi.
    # (take_along_axis(axis=1) lowers to a per-row gather, not a one-hot dot.)
    safe_tgt = jnp.where(tgt >= 0, tgt, 0)
    phi_t = jnp.take_along_axis(phi, safe_tgt[:, None], axis=1).astype(jnp.float32)
    tgt2d = tgt[:, None]                                          # (N, 1)

    # Row tile: 16-row aligned (bf16 sublane packing).  Guarantee >=2 row
    # blocks when N allows so the "parallel" axis feeds both v7x TensorCores.
    row_block = _round_up(row_block, 8)
    tm = min(row_block, _round_up(n, 16))
    if n > 16 and -(-n // tm) < 2:
        tm = _round_up(-(-n // 2), 16)

    # Class tile: full C, or a multiple of 128 lanes.  512x4096 f32 = 8 MiB per
    # cos tile (4 MiB bf16) -> 16 MiB double-buffered, plus ~1 MiB of
    # lane-padded (tm,1) operands + m/l scratch: well under the 48 MiB budget
    # (v7x has 64 MiB/TC physical; v5e/v6e have 128 MiB).
    tc = c if c <= class_block else class_block
    if tc != c:
        assert tc % 128 == 0, "class_block must be a multiple of 128 when tiling C"
    grid = (pl.cdiv(n, tm), pl.cdiv(c, tc))

    kernel = functools.partial(_arc_loss_kernel, n_rows=n, n_cols=c)

    loss_sum, cnt = pl.pallas_call(
        kernel,
        out_shape=(
            jax.ShapeDtypeStruct((grid[0], 1), jnp.float32),
            jax.ShapeDtypeStruct((grid[0], 1), jnp.float32),
        ),
        grid_spec=pltpu.PrefetchScalarGridSpec(
            num_scalar_prefetch=0,
            grid=grid,
            in_specs=[
                pl.BlockSpec((tm, tc), lambda i, j: (i, j)),   # cos tile
                pl.BlockSpec((tm, 1), lambda i, j: (i, 0)),    # target (per row)
                pl.BlockSpec((tm, 1), lambda i, j: (i, 0)),    # phi_t  (per row)
            ],
            out_specs=[
                pl.BlockSpec((1, 1), lambda i, j: (i, 0), memory_space=pltpu.SMEM),
                pl.BlockSpec((1, 1), lambda i, j: (i, 0), memory_space=pltpu.SMEM),
            ],
            scratch_shapes=[
                pltpu.VMEM((tm, 1), jnp.float32),   # running max    m
                pltpu.VMEM((tm, 1), jnp.float32),   # running sumexp l
            ],
        ),
        compiler_params=pltpu.CompilerParams(
            dimension_semantics=("parallel", "arbitrary"),
            vmem_limit_bytes=vmem_limit_bytes,
        ),
    )(cos, tgt2d, phi_t)

    total = jnp.sum(loss_sum)
    count = jnp.sum(cnt)
    # Matches torch cross_entropy(reduction='mean'): 0/0 -> NaN when all ignored.
    return total / count


def _reference(cos, phi, target):
    """Pure-JAX reference of the same forward pass (f32 math)."""
    cos = cos.astype(jnp.float32)
    phi = phi.astype(jnp.float32)
    n, c = cos.shape
    one_hot = jax.nn.one_hot(target, c, dtype=cos.dtype)  # all-zero for -100 rows
    logits = one_hot * phi + (1.0 - one_hot) * cos
    lse = jax.scipy.special.logsumexp(logits, axis=-1)
    tgt_logit = jnp.sum(one_hot * logits, axis=-1)
    valid = target != IGNORE_INDEX
    per_row = jnp.where(valid, lse - tgt_logit, 0.0)
    return jnp.sum(per_row) / jnp.sum(valid.astype(cos.dtype))


if __name__ == "__main__":
    # No learnable parameters in this module (weight=None case).

    # --- test 1: tiny shape, single tile with default tile params ---
    N, C = 8, 32
    k1, k2, k3 = jax.random.split(jax.random.PRNGKey(0), 3)
    cos = jax.random.uniform(k1, (N, C), jnp.float32, minval=-1.0, maxval=1.0)
    phi = jax.random.uniform(k2, (N, C), jnp.float32, minval=-1.0, maxval=1.0)
    target = jax.random.randint(k3, (N,), 0, C, dtype=jnp.int32)
    target = target.at[0].set(IGNORE_INDEX)  # exercise ignore_index path

    loss = jax.block_until_ready(parallel_arc_loss(cos, phi, target))
    ref = jax.block_until_ready(_reference(cos, phi, target))
    assert jnp.allclose(loss, ref, rtol=1e-5, atol=1e-5), (loss, ref)

    # --- test 2: non-divisible shapes -> row-tail + class-tile-tail masking ---
    N2, C2 = 20, 160
    k4, k5, k6 = jax.random.split(jax.random.PRNGKey(1), 3)
    cos2 = jax.random.uniform(k4, (N2, C2), jnp.float32, minval=-8.0, maxval=8.0)
    phi2 = jax.random.uniform(k5, (N2, C2), jnp.float32, minval=-8.0, maxval=8.0)
    target2 = jax.random.randint(k6, (N2,), 0, C2, dtype=jnp.int32)
    target2 = target2.at[3].set(IGNORE_INDEX)

    loss2 = jax.block_until_ready(
        parallel_arc_loss(cos2, phi2, target2, row_block=8, class_block=128))
    ref2 = jax.block_until_ready(_reference(cos2, phi2, target2))
    assert jnp.allclose(loss2, ref2, rtol=1e-5, atol=1e-5), (loss2, ref2)

    # --- test 3: bf16 streaming path, multiple row & class tiles, tails ---
    N3, C3 = 40, 640
    k7, k8, k9 = jax.random.split(jax.random.PRNGKey(2), 3)
    cos3 = jax.random.uniform(k7, (N3, C3), jnp.float32, -4.0, 4.0).astype(jnp.bfloat16)
    phi3 = jax.random.uniform(k8, (N3, C3), jnp.float32, -4.0, 4.0).astype(jnp.bfloat16)
    target3 = jax.random.randint(k9, (N3,), 0, C3, dtype=jnp.int32)
    target3 = target3.at[7].set(IGNORE_INDEX)

    loss3 = jax.block_until_ready(
        parallel_arc_loss(cos3, phi3, target3, row_block=16, class_block=256))
    ref3 = jax.block_until_ready(_reference(cos3, phi3, target3))
    assert jnp.allclose(loss3, ref3, rtol=1e-4, atol=1e-4), (loss3, ref3)

    print("KERNEL_OK")
</pallas_src>

<mosaic_0001>
module attributes {stable_mosaic.version = 11 : i64} {
  func.func @_arc_loss_kernel(%arg0: i32, %arg1: i32, %arg2: memref<16x32xf32, #tpu.memory_space<vmem>>, %arg3: memref<16x1xi32, #tpu.memory_space<vmem>>, %arg4: memref<16x1xf32, #tpu.memory_space<vmem>>, %arg5: memref<1x1xf32, #tpu.memory_space<smem>>, %arg6: memref<1x1xf32, #tpu.memory_space<smem>>, %arg7: memref<16x1xf32, #tpu.memory_space<vmem>>, %arg8: memref<16x1xf32, #tpu.memory_space<vmem>>) attributes {dimension_semantics = [#tpu.dimension_semantics<parallel>, #tpu.dimension_semantics<arbitrary>], iteration_bounds = array<i64: 1, 1>, scalar_prefetch = 0 : i64, scratch_operands = 2 : i64, tpu.core_type = #tpu.core_type<tc>, window_params = [{transform_indices = @transform_0, window_bounds = array<i64: 16, 32>}, {transform_indices = @transform_1, window_bounds = array<i64: 16, 1>}, {transform_indices = @transform_2, window_bounds = array<i64: 16, 1>}, {transform_indices = @transform_3, window_bounds = array<i64: 1, 1>}, {transform_indices = @transform_4, window_bounds = array<i64: 1, 1>}]} {
    %c0 = arith.constant 0 : index
    %c0_0 = arith.constant 0 : index
    %0 = vector.load %arg3[%c0, %c0_0] : memref<16x1xi32, #tpu.memory_space<vmem>>, vector<16x1xi32>
    %c0_1 = arith.constant 0 : index
    %c0_2 = arith.constant 0 : index
    %1 = vector.load %arg4[%c0_1, %c0_2] : memref<16x1xf32, #tpu.memory_space<vmem>>, vector<16x1xf32>
    %c0_i32 = arith.constant 0 : i32
    %2 = arith.cmpi eq, %arg1, %c0_i32 : i32
    %3 = arith.extui %2 : i1 to i32
    %c0_i32_3 = arith.constant 0 : i32
    %4 = arith.cmpi ne, %3, %c0_i32_3 : i32
    scf.if %4 {
      %c0_18 = arith.constant 0 : index
      %c0_19 = arith.constant 0 : index
      %33 = vector.load %arg7[%c0_18, %c0_19] : memref<16x1xf32, #tpu.memory_space<vmem>>, vector<16x1xf32>
      tpu.vector_store %arg7[%c0_18, %c0_19], %1 {strides = array<i32>} : memref<16x1xf32, #tpu.memory_space<vmem>>, vector<16x1xf32>,
      %cst_20 = arith.constant 1.000000e+00 : f32
      %34 = vector.broadcast %cst_20 : f32 to vector<16x1xf32>
      %c0_21 = arith.constant 0 : index
      %c0_22 = arith.constant 0 : index
      %35 = vector.load %arg8[%c0_21, %c0_22] : memref<16x1xf32, #tpu.memory_space<vmem>>, vector<16x1xf32>
      tpu.vector_store %arg8[%c0_21, %c0_22], %34 {strides = array<i32>} : memref<16x1xf32, #tpu.memory_space<vmem>>, vector<16x1xf32>,
    } else {
    }
    %c0_4 = arith.constant 0 : index
    %c0_5 = arith.constant 0 : index
    %5 = vector.load %arg2[%c0_4, %c0_5] : memref<16x32xf32, #tpu.memory_space<vmem>>, vector<16x32xf32>
    %6 = tpu.iota {dimensions = array<i32: 1>} : vector<16x32xi32>
    %c32_i32 = arith.constant 32 : i32
    %7 = arith.muli %arg1, %c32_i32 : i32
    %8 = vector.broadcast %7 : i32 to vector<16x1xi32>
    %9 = arith.subi %0, %8 : vector<16x1xi32>
    %10 = vector.broadcast %9 : vector<16x1xi32> to vector<16x32xi32>
    %11 = arith.cmpi ne, %6, %10 : vector<16x32xi32>
    %cst = arith.constant -1.000000e+30 : f32
    %12 = vector.broadcast %cst : f32 to vector<16x32xf32>
    %13 = arith.select %11, %5, %12 : vector<16x32xi1>, vector<16x32xf32>
    %cst_6 = arith.constant dense<0xFF800000> : vector<16xf32>
    %14 = vector.multi_reduction <maximumf>, %13, %cst_6 [1] : vector<16x32xf32> to vector<16xf32>
    %15 = vector.shape_cast %14 : vector<16xf32> to vector<16x1xf32>
    %c0_7 = arith.constant 0 : index
    %c0_8 = arith.constant 0 : index
    %16 = vector.load %arg7[%c0_7, %c0_8] : memref<16x1xf32, #tpu.memory_space<vmem>>, vector<16x1xf32>
    %17 = arith.maximumf %16, %15 : vector<16x1xf32>
    %18 = vector.broadcast %17 : vector<16x1xf32> to vector<16x32xf32>
    %19 = arith.subf %13, %18 : vector<16x32xf32>
    %20 = math.exp %19 : vector<16x32xf32>
    %c0_9 = arith.constant 0 : index
    %c0_10 = arith.constant 0 : index
    %21 = vector.load %arg8[%c0_9, %c0_10] : memref<16x1xf32, #tpu.memory_space<vmem>>, vector<16x1xf32>
    %22 = arith.subf %16, %17 : vector<16x1xf32>
    %23 = math.exp %22 : vector<16x1xf32>
    %24 = arith.mulf %21, %23 : vector<16x1xf32>
    %cst_11 = arith.constant dense<0.000000e+00> : vector<16xf32>
    %25 = vector.multi_reduction <add>, %20, %cst_11 [1] : vector<16x32xf32> to vector<16xf32>
    %26 = vector.shape_cast %25 : vector<16xf32> to vector<16x1xf32>
    %27 = arith.addf %24, %26 : vector<16x1xf32>
    %c0_12 = arith.constant 0 : index
    %c0_13 = arith.constant 0 : index
    %28 = vector.load %arg8[%c0_12, %c0_13] : memref<16x1xf32, #tpu.memory_space<vmem>>, vector<16x1xf32>
    tpu.vector_store %arg8[%c0_12, %c0_13], %27 {strides = array<i32>} : memref<16x1xf32, #tpu.memory_space<vmem>>, vector<16x1xf32>,
    %c0_14 = arith.constant 0 : index
    %c0_15 = arith.constant 0 : index
    %29 = vector.load %arg7[%c0_14, %c0_15] : memref<16x1xf32, #tpu.memory_space<vmem>>, vector<16x1xf32>
    tpu.vector_store %arg7[%c0_14, %c0_15], %17 {strides = array<i32>} : memref<16x1xf32, #tpu.memory_space<vmem>>, vector<16x1xf32>,
    %c0_i32_16 = arith.constant 0 : i32
    %30 = arith.cmpi eq, %arg1, %c0_i32_16 : i32
    %31 = arith.extui %30 : i1 to i32
    %c0_i32_17 = arith.constant 0 : i32
    %32 = arith.cmpi ne, %31, %c0_i32_17 : i32
    scf.if %32 {
      %c0_18 = arith.constant 0 : index
      %c0_19 = arith.constant 0 : index
      %33 = vector.load %arg7[%c0_18, %c0_19] : memref<16x1xf32, #tpu.memory_space<vmem>>, vector<16x1xf32>
      %c0_20 = arith.constant 0 : index
      %c0_21 = arith.constant 0 : index
      %34 = vector.load %arg8[%c0_20, %c0_21] : memref<16x1xf32, #tpu.memory_space<vmem>>, vector<16x1xf32>
      %35 = math.log %34 : vector<16x1xf32>
      %36 = arith.addf %33, %35 : vector<16x1xf32>
      %37 = arith.subf %36, %1 : vector<16x1xf32>
      %c-100_i32 = arith.constant -100 : i32
      %38 = vector.broadcast %c-100_i32 : i32 to vector<16x1xi32>
      %39 = arith.cmpi ne, %0, %38 : vector<16x1xi32>
      %c16_i32 = arith.constant 16 : i32
      %40 = arith.muli %arg0, %c16_i32 : i32
      %41 = tpu.iota {dimensions = array<i32: 0>} : vector<16x1xi32>
      %42 = vector.broadcast %40 : i32 to vector<16x1xi32>
      %43 = arith.addi %42, %41 : vector<16x1xi32>
      %c8_i32 = arith.constant 8 : i32
      %44 = vector.broadcast %c8_i32 : i32 to vector<16x1xi32>
      %45 = arith.cmpi slt, %43, %44 : vector<16x1xi32>
      %46 = arith.andi %39, %45 : vector<16x1xi1>
      %cst_22 = arith.constant 0.000000e+00 : f32
      %47 = vector.broadcast %cst_22 : f32 to vector<16x1xf32>
      %48 = arith.select %46, %37, %47 : vector<16x1xi1>, vector<16x1xf32>
      %49 = vector.shape_cast %48 : vector<16x1xf32> to vector<1x16x1xf32>
      %cst_23 = arith.constant dense<0.000000e+00> : vector<1xf32>
      %50 = vector.multi_reduction <add>, %49, %cst_23 [1, 2] : vector<1x16x1xf32> to vector<1xf32>
      %51 = vector.shape_cast %50 : vector<1xf32> to vector<1x1x1xf32>
      %52 = vector.extract %51[0, 0, 0] : f32 from vector<1x1x1xf32>
      %c0_24 = arith.constant 0 : index
      %c0_25 = arith.constant 0 : index
      %53 = memref.load %arg5[%c0_24, %c0_25] : memref<1x1xf32, #tpu.memory_space<smem>>
      memref.store %52, %arg5[%c0_24, %c0_25] : memref<1x1xf32, #tpu.memory_space<smem>>
      %54 = arith.extui %46 : vector<16x1xi1> to vector<16x1xi32>
      %55 = arith.sitofp %54 : vector<16x1xi32> to vector<16x1xf32>
      %56 = vector.shape_cast %55 : vector<16x1xf32> to vector<1x16x1xf32>
      %cst_26 = arith.constant dense<0.000000e+00> : vector<1xf32>
      %57 = vector.multi_reduction <add>, %56, %cst_26 [1, 2] : vector<1x16x1xf32> to vector<1xf32>
      %58 = vector.shape_cast %57 : vector<1xf32> to vector<1x1x1xf32>
      %59 = vector.extract %58[0, 0, 0] : f32 from vector<1x1x1xf32>
      %c0_27 = arith.constant 0 : index
      %c0_28 = arith.constant 0 : index
      %60 = memref.load %arg6[%c0_27, %c0_28] : memref<1x1xf32, #tpu.memory_space<smem>>
      memref.store %59, %arg6[%c0_27, %c0_28] : memref<1x1xf32, #tpu.memory_space<smem>>
    } else {
    }
    return
  }
  func.func @transform_0(%arg0: i32, %arg1: i32) -> (i32, i32) {
    %c0_i32 = arith.constant 0 : i32
    return %arg0, %arg1 : i32, i32
  }
  func.func @transform_1(%arg0: i32, %arg1: i32) -> (i32, i32) {
    %c0_i32 = arith.constant 0 : i32
    %c0_i32_0 = arith.constant 0 : i32
    return %arg0, %c0_i32 : i32, i32
  }
  func.func @transform_2(%arg0: i32, %arg1: i32) -> (i32, i32) {
    %c0_i32 = arith.constant 0 : i32
    %c0_i32_0 = arith.constant 0 : i32
    return %arg0, %c0_i32 : i32, i32
  }
  func.func @transform_3(%arg0: i32, %arg1: i32) -> (i32, i32) {
    %c0_i32 = arith.constant 0 : i32
    %c0_i32_0 = arith.constant 0 : i32
    return %arg0, %c0_i32 : i32, i32
  }
  func.func @transform_4(%arg0: i32, %arg1: i32) -> (i32, i32) {
    %c0_i32 = arith.constant 0 : i32
    %c0_i32_0 = arith.constant 0 : i32
    return %arg0, %c0_i32 : i32, i32
  }
}

</mosaic_0001>

<bundles_post_ra>
// kernel: tpu_custom_call.1
= control target key start
LH: loop header
LB: loop body
LE: loop exit
PB: predicated region body
PF: predicated region fallthrough
CT: control target
= control target key end

     0   :  { %10 = vsyncpa [#allocation5], 0  ;;  %s334_s0 = inlined_call_operand.vmem [shape: f32[8,32], index: 0, kind: input, shape index: {}]   ;;  %s335_s1 = inlined_call_operand.vmem [shape: s32[8,1], index: 1, kind: input, shape index: {}]   ;;  %s336_s2 = inlined_call_operand.vmem [shape: f32[8,1], index: 2, kind: input, shape index: {}]   ;;  %s337_s3 = inlined_call_operand.hbm [shape: f32[1,1], index: 3, kind: output, shape index: {0}]   ;;  %s338_s4 = inlined_call_operand.hbm [shape: f32[1,1], index: 4, kind: output, shape index: {1}]  }
   0x1   :  { %v265_v0 = vld [vmem:[%s335_s1] sm:$0xff] }
   0x2   :  { %11 = vsyncpa [#allocation7], 0  ;;  %v232_v1 = vmov 0   ;;  %v20_v2 = vld [vmem:[%s336_s2] sm:$0xff]  ;;  %vm26_vm0 = vcmask 7168   ;;  %v33_v3 = vlaneseq  ;;  %vm49_vm1 = vcmask 261120  }
   0x3   :  { %196 = vset.pattern.permute.xlu0 %v232_v1  ;;  %197 = vset.pattern.permute.xlu1 %v232_v1  ;;  %27 = vst.msk [vmem:[#allocation2] sm:$0xff] %vm26_vm0, %v20_v2  ;;  %v31_v5 = vld [vmem:[%s334_s0] sm:$0xff]  ;;  %v233_v9 = vmov 1.0   ;;  %v19_v14 = vld [vmem:[%s335_s1 + $0x8] sm:$0xff]  ;;  %vm114_vm4 = vcmp.ne.s32.totalorder %v265_v0, 4294967196  ;;  %v234_v42 = vmov 0.0  }
   0x4   :  { %40 = vperm.xlu0 %196, %v265_v0   ;;  %v34_v4 = vand.u32 127, %v33_v3  ;;  %29 = vst.msk [vmem:[#allocation3] sm:$0xff] %vm26_vm0, %v233_v9  ;;  %30 = vst.msk [vmem:[#allocation3 + $0x8] sm:$0xff] %vm26_vm0, %v233_v9  ;;  %v21_v15 = vld [vmem:[%s336_s2 + $0x8] sm:$0xff]  ;;  %v186_v43 = vsel %vm114_vm4, 1.0, %v234_v42  ;;  %s208_s27 = scalar_lea.hbm %s337_s3, 16 }
   0x5   :  { %28 = vst.msk [vmem:[#allocation2 + $0x8] sm:$0xff] %vm26_vm0, %v21_v15  ;;  %v32_v19 = vld [vmem:[%s334_s0 + $0x8] sm:$0xff]  ;;  %v147_v45 = vsel %vm26_vm0, %v186_v43, 0.0  ;;  %p209_p0 = scmp.ne.s32.totalorder %s337_s3, %s208_s27  ;;  %p212_p1 = scmp.lt.u32.totalorder %s208_s27, %s337_s3 }
   0x7   :  { %p214_p2 = pnand %p212_p1, %p209_p0 }
   0xa   :  { %v56_v10 = vld [vmem:[#allocation2] sm:$0xff] }
   0xb   :  { %v76_v31 = vld [vmem:[#allocation3] sm:$0xff] }
   0xc   :  { %v291_v26 = vld [vmem:[#allocation2 + $0x8] sm:$0xff] }
  0x83   :  { %v41_v6 = vpop.permute.xlu0 %40 }
  0x84   :  { %vm45_vm2 = vcmp.ne.s32.totalorder %v34_v4, %v41_v6 }
  0x85   :  { %v47_v7 = vsel %vm45_vm2, %v31_v5, -1e+30 }
  0x86   :  { %v50_v8 = vsel %vm49_vm1, %v47_v7, -inf }
  0x87   :  { %51 = vmax.xlane.f32.xlu0 %v50_v8 }
 0x114   :  { %v52_v11 = vpop.xlane.xlu0 %51 }
 0x115   :  { %v58_v12 = vmax.f32 %v56_v10, %v52_v11 }
 0x117   :  { %v78_v13 = vsub.f32 %v56_v10, %v58_v12  ;;  %97 = vst.msk [vmem:[#allocation2] sm:$0xff] %vm26_vm0, %v58_v12  ;;  %62 = vperm.xlu1 %197, %v58_v12  }
 0x119   :  { %v80_v25 = vmul.f32 1.442695, %v78_v13 }
 0x11b   :  { %43 = vperm.xlu1 %197, %v19_v14  }
 0x11e   :  { %v102_v38 = vld [vmem:[#allocation2] sm:$0xff] }
 0x196   :  { %v63_v16 = vpop.permute.xlu1 %62 }
 0x197   :  { %v70_v17 = vsub.f32 %v47_v7, %v63_v16 }
 0x199   :  { %v72_v18 = vmul.f32 1.442695, %v70_v17 }
 0x19a   :  { %v44_v20 = vpop.permute.xlu1 %43 }
 0x19b   :  { %198 = vpow2.f32 %v72_v18  ;;  %vm46_vm3 = vcmp.ne.s32.totalorder %v34_v4, %v44_v20 }
 0x19c   :  { %v48_v21 = vsel %vm46_vm3, %v32_v19, -1e+30  ;;  %200 = vpow2.f32 %v80_v25 }
 0x19d   :  { %v53_v22 = vsel %vm49_vm1, %v48_v21, -inf }
 0x19e   :  { %54 = vmax.xlane.f32.xlu0 %v53_v22 }
 0x1a5   :  { %v199_v23 = vpop.eup %198 }
 0x1a6   :  { %v86_v24 = vsel %vm49_vm1, %v199_v23, 0.0  ;;  %v201_v30 = vpop.eup %200 }
 0x1a7   :  { %87 = vadd.xlane.f32.xlu1 %v86_v24  ;;  %v84_v32 = vmul.f32 %v201_v30, %v76_v31 }
 0x22b   :  { %v55_v27 = vpop.xlane.xlu0 %54 }
 0x22c   :  { %v294_v28 = vmax.f32 %v291_v26, %v55_v27 }
 0x22e   :  { %v79_v29 = vsub.f32 %v291_v26, %v294_v28  ;;  %98 = vst.msk [vmem:[#allocation2 + $0x8] sm:$0xff] %vm26_vm0, %v294_v28  ;;  %67 = vperm.xlu0 %196, %v294_v28  }
 0x234   :  { %v88_v33 = vpop.xlane.xlu1 %87 }
 0x235   :  { %v92_v34 = vadd.f32 %v88_v33, %v84_v32 }
 0x237   :  { %95 = vst.msk [vmem:[#allocation3] sm:$0xff] %vm26_vm0, %v92_v34 }
 0x23e   :  { %v104_v35 = vld [vmem:[#allocation3] sm:$0xff] }
 0x23f   :  { %202 = vlog2.f32 %v104_v35 }
 0x249   :  { %v203_v36 = vpop.eup %202 }
 0x24a   :  { %v107_v37 = vmul.f32 0.6931472, %v203_v36 }
 0x24c   :  { %v110_v39 = vadd.f32 %v107_v37, %v102_v38 }
 0x24e   :  { %v112_v40 = vsub.f32 %v110_v39, %v20_v2 }
 0x250   :  { %v127_v41 = vsel %vm114_vm4, %v112_v40, 0.0 }
 0x251   :  { %v129_v44 = vsel %vm26_vm0, %v127_v41, 0.0 }
 0x252   :  { %132 = vadd.xlane.f32.xlu1 %v129_v44 }
 0x256   :  { %150 = vadd.xlane.f32.xlu1 %v147_v45 }
 0x2ad   :  { %v68_v46 = vpop.permute.xlu0 %67 }
 0x2ae   :  { %v71_v47 = vsub.f32 %v48_v21, %v68_v46 }
 0x2b0   :  { %v74_v48 = vmul.f32 1.442695, %v71_v47 }
 0x2b2   :  { %204 = vpow2.f32 %v74_v48 }
 0x2bc   :  { %v205_v49 = vpop.eup %204 }
 0x2bd   :  { %v89_v50 = vsel %vm49_vm1, %v205_v49, 0.0 }
 0x2be   :  { %90 = vadd.xlane.f32.xlu1 %v89_v50 }
 0x2df   :  { %v133_v51 = vpop.xlane.xlu1 %132 }
 0x2e0   :  { %v134_v52 = vrot.slane %v133_v51, 4 }
 0x2e2   :  { %v135_v53 = vadd.f32 %v134_v52, %v133_v51 }
 0x2e3   :  { %v151_v54 = vpop.xlane.xlu1 %150 }
 0x2e4   :  { %v136_v55 = vrot.slane %v135_v53, 2  ;;  %v152_v56 = vrot.slane %v151_v54, 4 }
 0x2e6   :  { %v137_v57 = vadd.f32 %v136_v55, %v135_v53  ;;  %v153_v58 = vadd.f32 %v152_v56, %v151_v54 }
 0x2e8   :  { %v138_v59 = vrot.slane %v137_v57, 1  ;;  %v154_v60 = vrot.slane %v153_v58, 2 }
 0x2ea   :  { %v139_v61 = vadd.f32 %v138_v59, %v137_v57  ;;  %v155_v62 = vadd.f32 %v154_v60, %v153_v58 }
 0x2ec   :  { %187 = vpush %v139_v61  ;;  %v156_v63 = vrot.slane %v155_v62, 1 }
 0x2ee   :  { %v157_v0 = vadd.f32 %v156_v63, %v155_v62 }
 0x2f0   :  { %189 = vpush %v157_v0 }
 0x31d   :  { %s188_s0 = spop %187 }
 0x31e   :  { %142 = sst [smem:[#allocation4]] %s188_s0 }
 0x31f   :  { %217 = shalt.err (!%p214_p2)
}
 0x320   :  { %s235_s6 = smov [#allocation4]   ;;  %s218_s12 = scalar_lea.hbm %s338_s4, 16 }
 0x321   :  { %168 = dma.smem_to_hbm %s235_s6, 16, %s337_s3, [#allocation5]  }
 0x322   :  { %s190_s9 = spop %189  ;;  %p219_p3 = scmp.ne.s32.totalorder %s338_s4, %s218_s12 }
 0x323   :  { %160 = sst [smem:[#allocation6]] %s190_s9  ;;  %p222_p4 = scmp.lt.u32.totalorder %s218_s12, %s338_s4 }
 0x325   :  { %p224_p5 = pnand %p222_p4, %p219_p3 }
 0x327   :  { %227 = shalt.err (!%p224_p5)
}
 0x328   :  { %s236_s17 = smov [#allocation6]   ;;  %v82_v1 = vmul.f32 1.442695, %v79_v29  ;;  %v77_v3 = vld [vmem:[#allocation3 + $0x8] sm:$0xff] }
 0x329   :  { %176 = dma.smem_to_hbm %s236_s17, 16, %s338_s4, [#allocation7]  }
 0x32a   :  { %206 = vpow2.f32 %v82_v1 }
 0x334   :  { %v207_v2 = vpop.eup %206 }
 0x335   :  { %v85_v4 = vmul.f32 %v207_v2, %v77_v3 }
 0x34b   :  { %v91_v5 = vpop.xlane.xlu1 %90 }
 0x34c   :  { %v93_v6 = vadd.f32 %v91_v5, %v85_v4 }
 0x34e   :  { %96 = vst.msk [vmem:[#allocation3 + $0x8] sm:$0xff] %vm26_vm0, %v93_v6 }
 0x34f   :  { %228 = dma.done.wait [#allocation5], 16  }
 0x350   :  { %229 = vsyncadd [#allocation5], 4294967280 }
 0x351   :  { %230 = dma.done.wait [#allocation7], 16  }
 0x352   :  { %231 = vsyncadd [#allocation7], 4294967280 }
 0x353   :  { %183 = sfence }
 0x354   :  { %184 = vsyncpa [#allocation5], 1 }
 0x355   :  { %185 = vsyncpa [#allocation7], 1 }

</bundles_post_ra>
